<compile_context>
chip_gen: v6e
topology: v6e:2x2x1
jax: 0.10.0
libtpu: 0.0.40
codegen_flags: <defaults>
</compile_context>

<pallas_src>
import jax
import jax.numpy as jnp
from jax.experimental import pallas as pl
from jax.experimental.pallas import tpu as pltpu

# Model hyper-params (from the PyTorch module)
INPUT_SIZE = 4
HIDDEN_SIZE = 4
BATCH_SIZE = 1
NUM_LAYERS = 1  # TODO(synk): only num_layers == 1 is implemented (matches the spec's constant)
SEQ_LEN = 8


def _make_rnn_kernel(T, B, H):
    """Build a single-shot RNN kernel with static T/B/H baked in."""

    def rnn_kernel(x_ref, w_ih_t_ref, w_hh_t_ref, b_ref, out_ref):
        # x_ref      : (T*B, I)  all time steps, resident in VMEM
        # w_ih_t_ref : (I, H)    W_ih transposed
        # w_hh_t_ref : (H, H)    W_hh transposed
        # b_ref      : (1, H)    b_ih + b_hh
        # out_ref    : (T*B, H)  hidden states for every time step

        # Hoisted input projection: one (T*B, I) @ (I, H) MXU matmul + bias,
        # batch-parallel over all T time steps.
        pre = (
            jnp.dot(x_ref[...], w_ih_t_ref[...], preferred_element_type=jnp.float32)
            + b_ref[...]
        )  # (T*B, H) float32
        w_hh_t = w_hh_t_ref[...]  # (H, H)

        # Serial recurrence, statically unrolled (T is small & static).
        # The 4x4 recurrent contraction is done as H broadcast multiply-adds
        # on the VPU instead of a per-step MXU matmul, so each dependent step
        # avoids MXU push/pop latency.
        h = jnp.zeros((B, H), dtype=jnp.float32)
        rows = []
        for t in range(T):
            acc = pre[t * B:(t + 1) * B, :]                      # (B, H)
            for j in range(H):
                acc = acc + h[:, j:j + 1] * w_hh_t[j:j + 1, :]   # VPU MAC
            h = jnp.tanh(acc)                                    # EUP
            rows.append(h)

        # Single contiguous (T*B, H) store.
        out_ref[...] = jnp.concatenate(rows, axis=0)

    return rnn_kernel


def rnn_forward(x, w_ih, w_hh, b_ih, b_hh):
    """x: (T, B, I) float32. Returns (T*B, H) float32."""
    T, B, I = x.shape
    H = w_ih.shape[0]

    x_flat = x.reshape(T * B, I)          # (T*B, I)
    w_ih_t = jnp.transpose(w_ih)          # (I, H)
    w_hh_t = jnp.transpose(w_hh)          # (H, H)
    b = (b_ih + b_hh).reshape(1, H)       # (1, H)

    vmem = pl.BlockSpec(memory_space=pltpu.MemorySpace.VMEM)
    out = pl.pallas_call(
        _make_rnn_kernel(T, B, H),
        out_shape=jax.ShapeDtypeStruct((T * B, H), jnp.float32),
        in_specs=[vmem, vmem, vmem, vmem],
        out_specs=vmem,
    )(x_flat, w_ih_t, w_hh_t, b)
    return out


def reference_rnn(x, w_ih, w_hh, b_ih, b_hh):
    T, B, _ = x.shape
    H = w_ih.shape[0]
    h = jnp.zeros((B, H), dtype=jnp.float32)
    outs = []
    for t in range(T):
        h = jnp.tanh(x[t] @ w_ih.T + b_ih + h @ w_hh.T + b_hh)
        outs.append(h)
    return jnp.stack(outs, axis=0).reshape(-1, H)


if __name__ == "__main__":
    key = jax.random.PRNGKey(0)
    k_x, k_wih, k_whh, k_bih, k_bhh = jax.random.split(key, 5)

    # deterministic parameter init, PyTorch-style U(-1/sqrt(H), 1/sqrt(H))
    bound = 1.0 / (HIDDEN_SIZE ** 0.5)
    w_ih = jax.random.uniform(k_wih, (HIDDEN_SIZE, INPUT_SIZE),
                              minval=-bound, maxval=bound, dtype=jnp.float32)
    w_hh = jax.random.uniform(k_whh, (HIDDEN_SIZE, HIDDEN_SIZE),
                              minval=-bound, maxval=bound, dtype=jnp.float32)
    b_ih = jax.random.uniform(k_bih, (HIDDEN_SIZE,),
                              minval=-bound, maxval=bound, dtype=jnp.float32)
    b_hh = jax.random.uniform(k_bhh, (HIDDEN_SIZE,),
                              minval=-bound, maxval=bound, dtype=jnp.float32)

    # input: (seq_len, batch, input_size) -- nn.RNN default layout
    x = jax.random.normal(k_x, (SEQ_LEN, BATCH_SIZE, INPUT_SIZE), dtype=jnp.float32)

    out = rnn_forward(x, w_ih, w_hh, b_ih, b_hh)
    out = jax.block_until_ready(out)

    ref = reference_rnn(x, w_ih, w_hh, b_ih, b_hh)
    assert out.shape == (SEQ_LEN * BATCH_SIZE, HIDDEN_SIZE), out.shape
    assert jnp.allclose(out, ref, atol=1e-5, rtol=1e-5), "mismatch vs reference"

    print("KERNEL_OK")
</pallas_src>

<mosaic_0001>
module attributes {stable_mosaic.version = 11 : i64} {
  func.func @rnn_kernel(%arg0: memref<8x4xf32, #tpu.memory_space<vmem>>, %arg1: memref<4x4xf32, #tpu.memory_space<vmem>>, %arg2: memref<4x4xf32, #tpu.memory_space<vmem>>, %arg3: memref<1x4xf32, #tpu.memory_space<vmem>>, %arg4: memref<8x4xf32, #tpu.memory_space<vmem>>) attributes {dimension_semantics = [], scalar_prefetch = 0 : i64, scratch_operands = 0 : i64, tpu.core_type = #tpu.core_type<tc>} {
    %c0 = arith.constant 0 : index
    %c0_0 = arith.constant 0 : index
    %0 = vector.load %arg0[%c0, %c0_0] : memref<8x4xf32, #tpu.memory_space<vmem>>, vector<8x4xf32>
    %c0_1 = arith.constant 0 : index
    %c0_2 = arith.constant 0 : index
    %1 = vector.load %arg1[%c0_1, %c0_2] : memref<4x4xf32, #tpu.memory_space<vmem>>, vector<4x4xf32>
    %cst = arith.constant dense<0.000000e+00> : vector<8x4xf32>
    %2 = tpu.matmul %0, %1, %cst {dimension_numbers = #tpu.dot_dimension_numbers<[1], [0], [0], [1], [0, 0, 1, 1], [], []>} : vector<8x4xf32>, vector<4x4xf32>, vector<8x4xf32> -> vector<8x4xf32>
    %c0_3 = arith.constant 0 : index
    %c0_4 = arith.constant 0 : index
    %3 = vector.load %arg3[%c0_3, %c0_4] : memref<1x4xf32, #tpu.memory_space<vmem>>, vector<1x4xf32>
    %4 = vector.broadcast %3 : vector<1x4xf32> to vector<8x4xf32>
    %5 = arith.addf %2, %4 : vector<8x4xf32>
    %c0_5 = arith.constant 0 : index
    %c0_6 = arith.constant 0 : index
    %6 = vector.load %arg2[%c0_5, %c0_6] : memref<4x4xf32, #tpu.memory_space<vmem>>, vector<4x4xf32>
    %cst_7 = arith.constant 0.000000e+00 : f32
    %7 = vector.broadcast %cst_7 : f32 to vector<1x4xf32>
    %8 = vector.extract_strided_slice %5 {offsets = [0, 0], sizes = [1, 4], strides = [1, 1]} : vector<8x4xf32> to vector<1x4xf32>
    %9 = vector.extract_strided_slice %7 {offsets = [0, 0], sizes = [1, 1], strides = [1, 1]} : vector<1x4xf32> to vector<1x1xf32>
    %10 = vector.extract_strided_slice %6 {offsets = [0, 0], sizes = [1, 4], strides = [1, 1]} : vector<4x4xf32> to vector<1x4xf32>
    %11 = vector.broadcast %9 : vector<1x1xf32> to vector<1x4xf32>
    %12 = arith.mulf %11, %10 : vector<1x4xf32>
    %13 = arith.addf %8, %12 : vector<1x4xf32>
    %14 = vector.extract_strided_slice %7 {offsets = [0, 1], sizes = [1, 1], strides = [1, 1]} : vector<1x4xf32> to vector<1x1xf32>
    %15 = vector.extract_strided_slice %6 {offsets = [1, 0], sizes = [1, 4], strides = [1, 1]} : vector<4x4xf32> to vector<1x4xf32>
    %16 = vector.broadcast %14 : vector<1x1xf32> to vector<1x4xf32>
    %17 = arith.mulf %16, %15 : vector<1x4xf32>
    %18 = arith.addf %13, %17 : vector<1x4xf32>
    %19 = vector.extract_strided_slice %7 {offsets = [0, 2], sizes = [1, 1], strides = [1, 1]} : vector<1x4xf32> to vector<1x1xf32>
    %20 = vector.extract_strided_slice %6 {offsets = [2, 0], sizes = [1, 4], strides = [1, 1]} : vector<4x4xf32> to vector<1x4xf32>
    %21 = vector.broadcast %19 : vector<1x1xf32> to vector<1x4xf32>
    %22 = arith.mulf %21, %20 : vector<1x4xf32>
    %23 = arith.addf %18, %22 : vector<1x4xf32>
    %24 = vector.extract_strided_slice %7 {offsets = [0, 3], sizes = [1, 1], strides = [1, 1]} : vector<1x4xf32> to vector<1x1xf32>
    %25 = vector.extract_strided_slice %6 {offsets = [3, 0], sizes = [1, 4], strides = [1, 1]} : vector<4x4xf32> to vector<1x4xf32>
    %26 = vector.broadcast %24 : vector<1x1xf32> to vector<1x4xf32>
    %27 = arith.mulf %26, %25 : vector<1x4xf32>
    %28 = arith.addf %23, %27 : vector<1x4xf32>
    %29 = math.tanh %28 : vector<1x4xf32>
    %30 = vector.extract_strided_slice %5 {offsets = [1, 0], sizes = [1, 4], strides = [1, 1]} : vector<8x4xf32> to vector<1x4xf32>
    %31 = vector.extract_strided_slice %29 {offsets = [0, 0], sizes = [1, 1], strides = [1, 1]} : vector<1x4xf32> to vector<1x1xf32>
    %32 = vector.extract_strided_slice %6 {offsets = [0, 0], sizes = [1, 4], strides = [1, 1]} : vector<4x4xf32> to vector<1x4xf32>
    %33 = vector.broadcast %31 : vector<1x1xf32> to vector<1x4xf32>
    %34 = arith.mulf %33, %32 : vector<1x4xf32>
    %35 = arith.addf %30, %34 : vector<1x4xf32>
    %36 = vector.extract_strided_slice %29 {offsets = [0, 1], sizes = [1, 1], strides = [1, 1]} : vector<1x4xf32> to vector<1x1xf32>
    %37 = vector.extract_strided_slice %6 {offsets = [1, 0], sizes = [1, 4], strides = [1, 1]} : vector<4x4xf32> to vector<1x4xf32>
    %38 = vector.broadcast %36 : vector<1x1xf32> to vector<1x4xf32>
    %39 = arith.mulf %38, %37 : vector<1x4xf32>
    %40 = arith.addf %35, %39 : vector<1x4xf32>
    %41 = vector.extract_strided_slice %29 {offsets = [0, 2], sizes = [1, 1], strides = [1, 1]} : vector<1x4xf32> to vector<1x1xf32>
    %42 = vector.extract_strided_slice %6 {offsets = [2, 0], sizes = [1, 4], strides = [1, 1]} : vector<4x4xf32> to vector<1x4xf32>
    %43 = vector.broadcast %41 : vector<1x1xf32> to vector<1x4xf32>
    %44 = arith.mulf %43, %42 : vector<1x4xf32>
    %45 = arith.addf %40, %44 : vector<1x4xf32>
    %46 = vector.extract_strided_slice %29 {offsets = [0, 3], sizes = [1, 1], strides = [1, 1]} : vector<1x4xf32> to vector<1x1xf32>
    %47 = vector.extract_strided_slice %6 {offsets = [3, 0], sizes = [1, 4], strides = [1, 1]} : vector<4x4xf32> to vector<1x4xf32>
    %48 = vector.broadcast %46 : vector<1x1xf32> to vector<1x4xf32>
    %49 = arith.mulf %48, %47 : vector<1x4xf32>
    %50 = arith.addf %45, %49 : vector<1x4xf32>
    %51 = math.tanh %50 : vector<1x4xf32>
    %52 = vector.extract_strided_slice %5 {offsets = [2, 0], sizes = [1, 4], strides = [1, 1]} : vector<8x4xf32> to vector<1x4xf32>
    %53 = vector.extract_strided_slice %51 {offsets = [0, 0], sizes = [1, 1], strides = [1, 1]} : vector<1x4xf32> to vector<1x1xf32>
    %54 = vector.extract_strided_slice %6 {offsets = [0, 0], sizes = [1, 4], strides = [1, 1]} : vector<4x4xf32> to vector<1x4xf32>
    %55 = vector.broadcast %53 : vector<1x1xf32> to vector<1x4xf32>
    %56 = arith.mulf %55, %54 : vector<1x4xf32>
    %57 = arith.addf %52, %56 : vector<1x4xf32>
    %58 = vector.extract_strided_slice %51 {offsets = [0, 1], sizes = [1, 1], strides = [1, 1]} : vector<1x4xf32> to vector<1x1xf32>
    %59 = vector.extract_strided_slice %6 {offsets = [1, 0], sizes = [1, 4], strides = [1, 1]} : vector<4x4xf32> to vector<1x4xf32>
    %60 = vector.broadcast %58 : vector<1x1xf32> to vector<1x4xf32>
    %61 = arith.mulf %60, %59 : vector<1x4xf32>
    %62 = arith.addf %57, %61 : vector<1x4xf32>
    %63 = vector.extract_strided_slice %51 {offsets = [0, 2], sizes = [1, 1], strides = [1, 1]} : vector<1x4xf32> to vector<1x1xf32>
    %64 = vector.extract_strided_slice %6 {offsets = [2, 0], sizes = [1, 4], strides = [1, 1]} : vector<4x4xf32> to vector<1x4xf32>
    %65 = vector.broadcast %63 : vector<1x1xf32> to vector<1x4xf32>
    %66 = arith.mulf %65, %64 : vector<1x4xf32>
    %67 = arith.addf %62, %66 : vector<1x4xf32>
    %68 = vector.extract_strided_slice %51 {offsets = [0, 3], sizes = [1, 1], strides = [1, 1]} : vector<1x4xf32> to vector<1x1xf32>
    %69 = vector.extract_strided_slice %6 {offsets = [3, 0], sizes = [1, 4], strides = [1, 1]} : vector<4x4xf32> to vector<1x4xf32>
    %70 = vector.broadcast %68 : vector<1x1xf32> to vector<1x4xf32>
    %71 = arith.mulf %70, %69 : vector<1x4xf32>
    %72 = arith.addf %67, %71 : vector<1x4xf32>
    %73 = math.tanh %72 : vector<1x4xf32>
    %74 = vector.extract_strided_slice %5 {offsets = [3, 0], sizes = [1, 4], strides = [1, 1]} : vector<8x4xf32> to vector<1x4xf32>
    %75 = vector.extract_strided_slice %73 {offsets = [0, 0], sizes = [1, 1], strides = [1, 1]} : vector<1x4xf32> to vector<1x1xf32>
    %76 = vector.extract_strided_slice %6 {offsets = [0, 0], sizes = [1, 4], strides = [1, 1]} : vector<4x4xf32> to vector<1x4xf32>
    %77 = vector.broadcast %75 : vector<1x1xf32> to vector<1x4xf32>
    %78 = arith.mulf %77, %76 : vector<1x4xf32>
    %79 = arith.addf %74, %78 : vector<1x4xf32>
    %80 = vector.extract_strided_slice %73 {offsets = [0, 1], sizes = [1, 1], strides = [1, 1]} : vector<1x4xf32> to vector<1x1xf32>
    %81 = vector.extract_strided_slice %6 {offsets = [1, 0], sizes = [1, 4], strides = [1, 1]} : vector<4x4xf32> to vector<1x4xf32>
    %82 = vector.broadcast %80 : vector<1x1xf32> to vector<1x4xf32>
    %83 = arith.mulf %82, %81 : vector<1x4xf32>
    %84 = arith.addf %79, %83 : vector<1x4xf32>
    %85 = vector.extract_strided_slice %73 {offsets = [0, 2], sizes = [1, 1], strides = [1, 1]} : vector<1x4xf32> to vector<1x1xf32>
    %86 = vector.extract_strided_slice %6 {offsets = [2, 0], sizes = [1, 4], strides = [1, 1]} : vector<4x4xf32> to vector<1x4xf32>
    %87 = vector.broadcast %85 : vector<1x1xf32> to vector<1x4xf32>
    %88 = arith.mulf %87, %86 : vector<1x4xf32>
    %89 = arith.addf %84, %88 : vector<1x4xf32>
    %90 = vector.extract_strided_slice %73 {offsets = [0, 3], sizes = [1, 1], strides = [1, 1]} : vector<1x4xf32> to vector<1x1xf32>
    %91 = vector.extract_strided_slice %6 {offsets = [3, 0], sizes = [1, 4], strides = [1, 1]} : vector<4x4xf32> to vector<1x4xf32>
    %92 = vector.broadcast %90 : vector<1x1xf32> to vector<1x4xf32>
    %93 = arith.mulf %92, %91 : vector<1x4xf32>
    %94 = arith.addf %89, %93 : vector<1x4xf32>
    %95 = math.tanh %94 : vector<1x4xf32>
    %96 = vector.extract_strided_slice %5 {offsets = [4, 0], sizes = [1, 4], strides = [1, 1]} : vector<8x4xf32> to vector<1x4xf32>
    %97 = vector.extract_strided_slice %95 {offsets = [0, 0], sizes = [1, 1], strides = [1, 1]} : vector<1x4xf32> to vector<1x1xf32>
    %98 = vector.extract_strided_slice %6 {offsets = [0, 0], sizes = [1, 4], strides = [1, 1]} : vector<4x4xf32> to vector<1x4xf32>
    %99 = vector.broadcast %97 : vector<1x1xf32> to vector<1x4xf32>
    %100 = arith.mulf %99, %98 : vector<1x4xf32>
    %101 = arith.addf %96, %100 : vector<1x4xf32>
    %102 = vector.extract_strided_slice %95 {offsets = [0, 1], sizes = [1, 1], strides = [1, 1]} : vector<1x4xf32> to vector<1x1xf32>
    %103 = vector.extract_strided_slice %6 {offsets = [1, 0], sizes = [1, 4], strides = [1, 1]} : vector<4x4xf32> to vector<1x4xf32>
    %104 = vector.broadcast %102 : vector<1x1xf32> to vector<1x4xf32>
    %105 = arith.mulf %104, %103 : vector<1x4xf32>
    %106 = arith.addf %101, %105 : vector<1x4xf32>
    %107 = vector.extract_strided_slice %95 {offsets = [0, 2], sizes = [1, 1], strides = [1, 1]} : vector<1x4xf32> to vector<1x1xf32>
    %108 = vector.extract_strided_slice %6 {offsets = [2, 0], sizes = [1, 4], strides = [1, 1]} : vector<4x4xf32> to vector<1x4xf32>
    %109 = vector.broadcast %107 : vector<1x1xf32> to vector<1x4xf32>
    %110 = arith.mulf %109, %108 : vector<1x4xf32>
    %111 = arith.addf %106, %110 : vector<1x4xf32>
    %112 = vector.extract_strided_slice %95 {offsets = [0, 3], sizes = [1, 1], strides = [1, 1]} : vector<1x4xf32> to vector<1x1xf32>
    %113 = vector.extract_strided_slice %6 {offsets = [3, 0], sizes = [1, 4], strides = [1, 1]} : vector<4x4xf32> to vector<1x4xf32>
    %114 = vector.broadcast %112 : vector<1x1xf32> to vector<1x4xf32>
    %115 = arith.mulf %114, %113 : vector<1x4xf32>
    %116 = arith.addf %111, %115 : vector<1x4xf32>
    %117 = math.tanh %116 : vector<1x4xf32>
    %118 = vector.extract_strided_slice %5 {offsets = [5, 0], sizes = [1, 4], strides = [1, 1]} : vector<8x4xf32> to vector<1x4xf32>
    %119 = vector.extract_strided_slice %117 {offsets = [0, 0], sizes = [1, 1], strides = [1, 1]} : vector<1x4xf32> to vector<1x1xf32>
    %120 = vector.extract_strided_slice %6 {offsets = [0, 0], sizes = [1, 4], strides = [1, 1]} : vector<4x4xf32> to vector<1x4xf32>
    %121 = vector.broadcast %119 : vector<1x1xf32> to vector<1x4xf32>
    %122 = arith.mulf %121, %120 : vector<1x4xf32>
    %123 = arith.addf %118, %122 : vector<1x4xf32>
    %124 = vector.extract_strided_slice %117 {offsets = [0, 1], sizes = [1, 1], strides = [1, 1]} : vector<1x4xf32> to vector<1x1xf32>
    %125 = vector.extract_strided_slice %6 {offsets = [1, 0], sizes = [1, 4], strides = [1, 1]} : vector<4x4xf32> to vector<1x4xf32>
    %126 = vector.broadcast %124 : vector<1x1xf32> to vector<1x4xf32>
    %127 = arith.mulf %126, %125 : vector<1x4xf32>
    %128 = arith.addf %123, %127 : vector<1x4xf32>
    %129 = vector.extract_strided_slice %117 {offsets = [0, 2], sizes = [1, 1], strides = [1, 1]} : vector<1x4xf32> to vector<1x1xf32>
    %130 = vector.extract_strided_slice %6 {offsets = [2, 0], sizes = [1, 4], strides = [1, 1]} : vector<4x4xf32> to vector<1x4xf32>
    %131 = vector.broadcast %129 : vector<1x1xf32> to vector<1x4xf32>
    %132 = arith.mulf %131, %130 : vector<1x4xf32>
    %133 = arith.addf %128, %132 : vector<1x4xf32>
    %134 = vector.extract_strided_slice %117 {offsets = [0, 3], sizes = [1, 1], strides = [1, 1]} : vector<1x4xf32> to vector<1x1xf32>
    %135 = vector.extract_strided_slice %6 {offsets = [3, 0], sizes = [1, 4], strides = [1, 1]} : vector<4x4xf32> to vector<1x4xf32>
    %136 = vector.broadcast %134 : vector<1x1xf32> to vector<1x4xf32>
    %137 = arith.mulf %136, %135 : vector<1x4xf32>
    %138 = arith.addf %133, %137 : vector<1x4xf32>
    %139 = math.tanh %138 : vector<1x4xf32>
    %140 = vector.extract_strided_slice %5 {offsets = [6, 0], sizes = [1, 4], strides = [1, 1]} : vector<8x4xf32> to vector<1x4xf32>
    %141 = vector.extract_strided_slice %139 {offsets = [0, 0], sizes = [1, 1], strides = [1, 1]} : vector<1x4xf32> to vector<1x1xf32>
    %142 = vector.extract_strided_slice %6 {offsets = [0, 0], sizes = [1, 4], strides = [1, 1]} : vector<4x4xf32> to vector<1x4xf32>
    %143 = vector.broadcast %141 : vector<1x1xf32> to vector<1x4xf32>
    %144 = arith.mulf %143, %142 : vector<1x4xf32>
    %145 = arith.addf %140, %144 : vector<1x4xf32>
    %146 = vector.extract_strided_slice %139 {offsets = [0, 1], sizes = [1, 1], strides = [1, 1]} : vector<1x4xf32> to vector<1x1xf32>
    %147 = vector.extract_strided_slice %6 {offsets = [1, 0], sizes = [1, 4], strides = [1, 1]} : vector<4x4xf32> to vector<1x4xf32>
    %148 = vector.broadcast %146 : vector<1x1xf32> to vector<1x4xf32>
    %149 = arith.mulf %148, %147 : vector<1x4xf32>
    %150 = arith.addf %145, %149 : vector<1x4xf32>
    %151 = vector.extract_strided_slice %139 {offsets = [0, 2], sizes = [1, 1], strides = [1, 1]} : vector<1x4xf32> to vector<1x1xf32>
    %152 = vector.extract_strided_slice %6 {offsets = [2, 0], sizes = [1, 4], strides = [1, 1]} : vector<4x4xf32> to vector<1x4xf32>
    %153 = vector.broadcast %151 : vector<1x1xf32> to vector<1x4xf32>
    %154 = arith.mulf %153, %152 : vector<1x4xf32>
    %155 = arith.addf %150, %154 : vector<1x4xf32>
    %156 = vector.extract_strided_slice %139 {offsets = [0, 3], sizes = [1, 1], strides = [1, 1]} : vector<1x4xf32> to vector<1x1xf32>
    %157 = vector.extract_strided_slice %6 {offsets = [3, 0], sizes = [1, 4], strides = [1, 1]} : vector<4x4xf32> to vector<1x4xf32>
    %158 = vector.broadcast %156 : vector<1x1xf32> to vector<1x4xf32>
    %159 = arith.mulf %158, %157 : vector<1x4xf32>
    %160 = arith.addf %155, %159 : vector<1x4xf32>
    %161 = math.tanh %160 : vector<1x4xf32>
    %162 = vector.extract_strided_slice %5 {offsets = [7, 0], sizes = [1, 4], strides = [1, 1]} : vector<8x4xf32> to vector<1x4xf32>
    %163 = vector.extract_strided_slice %161 {offsets = [0, 0], sizes = [1, 1], strides = [1, 1]} : vector<1x4xf32> to vector<1x1xf32>
    %164 = vector.extract_strided_slice %6 {offsets = [0, 0], sizes = [1, 4], strides = [1, 1]} : vector<4x4xf32> to vector<1x4xf32>
    %165 = vector.broadcast %163 : vector<1x1xf32> to vector<1x4xf32>
    %166 = arith.mulf %165, %164 : vector<1x4xf32>
    %167 = arith.addf %162, %166 : vector<1x4xf32>
    %168 = vector.extract_strided_slice %161 {offsets = [0, 1], sizes = [1, 1], strides = [1, 1]} : vector<1x4xf32> to vector<1x1xf32>
    %169 = vector.extract_strided_slice %6 {offsets = [1, 0], sizes = [1, 4], strides = [1, 1]} : vector<4x4xf32> to vector<1x4xf32>
    %170 = vector.broadcast %168 : vector<1x1xf32> to vector<1x4xf32>
    %171 = arith.mulf %170, %169 : vector<1x4xf32>
    %172 = arith.addf %167, %171 : vector<1x4xf32>
    %173 = vector.extract_strided_slice %161 {offsets = [0, 2], sizes = [1, 1], strides = [1, 1]} : vector<1x4xf32> to vector<1x1xf32>
    %174 = vector.extract_strided_slice %6 {offsets = [2, 0], sizes = [1, 4], strides = [1, 1]} : vector<4x4xf32> to vector<1x4xf32>
    %175 = vector.broadcast %173 : vector<1x1xf32> to vector<1x4xf32>
    %176 = arith.mulf %175, %174 : vector<1x4xf32>
    %177 = arith.addf %172, %176 : vector<1x4xf32>
    %178 = vector.extract_strided_slice %161 {offsets = [0, 3], sizes = [1, 1], strides = [1, 1]} : vector<1x4xf32> to vector<1x1xf32>
    %179 = vector.extract_strided_slice %6 {offsets = [3, 0], sizes = [1, 4], strides = [1, 1]} : vector<4x4xf32> to vector<1x4xf32>
    %180 = vector.broadcast %178 : vector<1x1xf32> to vector<1x4xf32>
    %181 = arith.mulf %180, %179 : vector<1x4xf32>
    %182 = arith.addf %177, %181 : vector<1x4xf32>
    %183 = math.tanh %182 : vector<1x4xf32>
    %184 = tpu.concatenate %29, %51, %73, %95, %117, %139, %161, %183 in 0 : vector<1x4xf32>, vector<1x4xf32>, vector<1x4xf32>, vector<1x4xf32>, vector<1x4xf32>, vector<1x4xf32>, vector<1x4xf32>, vector<1x4xf32> -> vector<8x4xf32>
    %c0_8 = arith.constant 0 : index
    %c0_9 = arith.constant 0 : index
    %185 = vector.load %arg4[%c0_8, %c0_9] : memref<8x4xf32, #tpu.memory_space<vmem>>, vector<8x4xf32>
    tpu.vector_store %arg4[%c0_8, %c0_9], %184 {strides = array<i32>} : memref<8x4xf32, #tpu.memory_space<vmem>>, vector<8x4xf32>,
    return
  }
}

</mosaic_0001>

<bundles_post_ra>
// kernel: tpu_custom_call.1
= control target key start
LH: loop header
LB: loop body
LE: loop exit
PB: predicated region body
PF: predicated region fallthrough
CT: control target
= control target key end

     0   :  { %vm30_vm0 = vcmask 1043456   ;;  %vm26_vm1 = vcmask 31744   ;;  %v477_v0 = vmov 0.0   ;;  %vm478_vm2 = vmmov 0   ;;  %s617_s1 = inlined_call_operand.vmem [shape: f32[4,4], index: 1, kind: input, shape index: {}]   ;;  %s618_s0 = inlined_call_operand.vmem [shape: f32[8,4], index: 0, kind: input, shape index: {}]   ;;  %s619_s2 = inlined_call_operand.vmem [shape: f32[4,4], index: 2, kind: input, shape index: {}]   ;;  %s620_s3 = inlined_call_operand.vmem [shape: f32[1,4], index: 3, kind: input, shape index: {}]   ;;  %s621_s4 = inlined_call_operand.vmem [shape: f32[8,4], index: 4, kind: output, shape index: {}]  }
   0x1   :  { %422 = vmatprep.subr.mxu0 %v477_v0  ;;  %v18_v1 = vld [vmem:[%s617_s1] sm:$0xf]  ;;  %424 = vmatprep.mubr.msk.f32.mxu0 %vm478_vm2, %v477_v0  ;;  %v479_v3 = vmov 2   ;;  %v480_v4 = vmov 0   ;;  %v481_v19 = vmov 3   ;;  %v482_v20 = vmov 1  }
   0x2   :  { %v17_v2 = vld [vmem:[%s618_s0] sm:$0xff]  ;;  %423 = vmatpush3.msk.msra.mxu0 %vm30_vm0, %v18_v1  ;;  %435 = vset.pattern.permute.xlu1 %v479_v3  ;;  %vm399_vm3 = vcmask 1040384   ;;  %vm401_vm4 = vcmask 1041408   ;;  %vm403_vm5 = vcmask 1042432   ;;  %vm406_vm6 = vcmask 1044480  }
   0x3   :  { %425 = vmatmul.mubr.msk.f32.vlgmr.msra.gmra.mxu0 %vm26_vm1, %v17_v2  ;;  %433 = vset.pattern.permute.xlu0 %v480_v4  ;;  %v521_v5 = vld [vmem:[%s619_s2] sm:$0xf]  ;;  %vm408_vm7 = vcmask 1045504   ;;  %vm410_vm8 = vcmask 1046528  }
   0x4   :  { %v105_v6 = vmul.f32 0.0, %v521_v5  ;;  %v417_v7 = vld [vmem:[%s620_s3] ss:$0 sm:$0xff]  ;;  %v535_v24 = vrot.slane %v521_v5, 2  ;;  %v538_v25 = vrot.slane %v521_v5, 1  ;;  %v541_v27 = vrot.slane %v521_v5, 3 }
   0x5   :  { %v552_v41 = vrot.slane %v521_v5, 7  ;;  %v564_v61 = vrot.slane %v521_v5, 6 }
   0x6   :  { %v108_v10 = vrot.slane %v105_v6, 1  ;;  %v111_v13 = vrot.slane %v105_v6, 2  ;;  %v114_v15 = vrot.slane %v105_v6, 3 }
  0xc3   :  { %v100_v8 = vpop.f32.mrf.mxu0 }
  0xc4   :  { %v527_v9 = vadd.f32 %v417_v7, %v100_v8 }
  0xc5   :  { %v426_v11 = vpop.f32.mrf.mxu0 }
  0xc6   :  { %v106_v12 = vadd.f32 %v105_v6, %v527_v9 }
  0xc8   :  { %v110_v14 = vadd.f32 %v108_v10, %v106_v12 }
  0xca   :  { %v113_v16 = vadd.f32 %v111_v13, %v110_v14 }
  0xcc   :  { %v116_v17 = vadd.f32 %v114_v15, %v113_v16 }
  0xce   :  { %461 = vtanh.f32 %v116_v17 }
  0xdb   :  { %v462_v18 = vpop.eup %461 }
  0xdc   :  { %141 = vperm.xlu1 %435, %v462_v18   ;;  %120 = vperm.xlu0 %433, %v462_v18  }
  0xe0   :  { %436 = vset.pattern.permute.xlu1 %v481_v19  ;;  %434 = vset.pattern.permute.xlu0 %v482_v20 }
  0xe1   :  { %152 = vperm.xlu1 %436, %v462_v18   ;;  %129 = vperm.xlu0 %434, %v462_v18  }
  0xe5   :  { %437 = vset.pattern.permute.xlu1 %v480_v4 }
 0x157   :  { %v142_v21 = vpop.permute.xlu1 %141  ;;  %v121_v22 = vpop.permute.xlu0 %120 }
 0x158   :  { %v123_v23 = vmul.f32 %v121_v22, %v521_v5  ;;  %v146_v30 = vmul.f32 %v535_v24, %v142_v21  ;;  %v576_v22 = vrot.slane %v521_v5, 5 }
 0x15a   :  { %v125_v26 = vrot.slane %v123_v23, 7  ;;  %v148_v35 = vrot.slane %v146_v30, 7 }
 0x15c   :  { %v153_v28 = vpop.permute.xlu1 %152  ;;  %v130_v29 = vpop.permute.xlu0 %129  ;;  %v127_v32 = vadd.f32 %v125_v26, %v527_v9 }
 0x15d   :  { %v135_v31 = vmul.f32 %v538_v25, %v130_v29  ;;  %v157_v33 = vmul.f32 %v541_v27, %v153_v28 }
 0x15f   :  { %v137_v34 = vrot.slane %v135_v31, 7  ;;  %v159_v37 = vrot.slane %v157_v33, 7 }
 0x161   :  { %v139_v36 = vadd.f32 %v137_v34, %v127_v32 }
 0x163   :  { %v150_v38 = vadd.f32 %v148_v35, %v139_v36 }
 0x165   :  { %v161_v39 = vadd.f32 %v159_v37, %v150_v38 }
 0x167   :  { %463 = vtanh.f32 %v161_v39 }
 0x174   :  { %v464_v40 = vpop.eup %463 }
 0x175   :  { %176 = vperm.xlu0 %434, %v464_v40   ;;  %165 = vperm.xlu1 %437, %v464_v40   ;;  %v400_v59 = vsel %vm399_vm3, %v462_v18, %v464_v40 }
 0x179   :  { %439 = vset.pattern.permute.xlu0 %v481_v19  ;;  %438 = vset.pattern.permute.xlu1 %v479_v3 }
 0x17a   :  { %194 = vperm.xlu0 %439, %v464_v40   ;;  %185 = vperm.xlu1 %438, %v464_v40  }
 0x17e   :  { %442 = vset.pattern.permute.xlu0 %v479_v3  ;;  %440 = vset.pattern.permute.xlu1 %v480_v4 }
 0x1f0   :  { %v177_v42 = vpop.permute.xlu0 %176  ;;  %v166_v43 = vpop.permute.xlu1 %165 }
 0x1f1   :  { %v179_v44 = vmul.f32 %v177_v42, %v521_v5  ;;  %v170_v45 = vmul.f32 %v552_v41, %v166_v43 }
 0x1f3   :  { %v172_v46 = vrot.slane %v170_v45, 7  ;;  %v181_v47 = vrot.slane %v179_v44, 7  ;;  %v589_v44 = vrot.slane %v521_v5, 4 }
 0x1f5   :  { %v174_v48 = vadd.f32 %v172_v46, %v527_v9  ;;  %v195_v49 = vpop.permute.xlu0 %194  ;;  %v186_v50 = vpop.permute.xlu1 %185 }
 0x1f6   :  { %v197_v51 = vmul.f32 %v195_v49, %v535_v24  ;;  %v188_v52 = vmul.f32 %v186_v50, %v538_v25 }
 0x1f7   :  { %v183_v53 = vadd.f32 %v181_v47, %v174_v48 }
 0x1f8   :  { %v190_v54 = vrot.slane %v188_v52, 7  ;;  %v199_v55 = vrot.slane %v197_v51, 7 }
 0x1fa   :  { %v192_v56 = vadd.f32 %v190_v54, %v183_v53 }
 0x1fc   :  { %v201_v57 = vadd.f32 %v199_v55, %v192_v56 }
 0x1fe   :  { %465 = vtanh.f32 %v201_v57 }
 0x20b   :  { %v466_v58 = vpop.eup %465 }
 0x20c   :  { %225 = vperm.xlu0 %442, %v466_v58   ;;  %205 = vperm.xlu1 %440, %v466_v58   ;;  %v402_v60 = vsel %vm401_vm4, %v400_v59, %v466_v58 }
 0x210   :  { %441 = vset.pattern.permute.xlu1 %v482_v20  ;;  %445 = vset.pattern.permute.xlu0 %v482_v20 }
 0x211   :  { %216 = vperm.xlu1 %441, %v466_v58  }
 0x215   :  { %443 = vset.pattern.permute.xlu1 %v481_v19 }
 0x216   :  { %234 = vperm.xlu1 %443, %v466_v58  }
 0x21a   :  { %444 = vset.pattern.permute.xlu1 %v480_v4 }
 0x287   :  { %v206_v62 = vpop.permute.xlu1 %205  ;;  %v226_v0 = vpop.permute.xlu0 %225 }
 0x288   :  { %v210_v63 = vmul.f32 %v564_v61, %v206_v62  ;;  %v228_v6 = vmul.f32 %v226_v0, %v521_v5 }
 0x28a   :  { %v212_v1 = vrot.slane %v210_v63, 7  ;;  %v230_v11 = vrot.slane %v228_v6, 7 }
 0x28c   :  { %v217_v2 = vpop.permute.xlu1 %216  ;;  %v214_v8 = vadd.f32 %v212_v1, %v527_v9 }
 0x28d   :  { %v219_v7 = vmul.f32 %v217_v2, %v552_v41 }
 0x28f   :  { %v221_v10 = vrot.slane %v219_v7, 7 }
 0x291   :  { %v223_v12 = vadd.f32 %v221_v10, %v214_v8  ;;  %v235_v13 = vpop.permute.xlu1 %234 }
 0x292   :  { %v237_v14 = vmul.f32 %v235_v13, %v538_v25 }
 0x293   :  { %v232_v15 = vadd.f32 %v230_v11, %v223_v12 }
 0x294   :  { %v239_v16 = vrot.slane %v237_v14, 7 }
 0x296   :  { %v241_v17 = vadd.f32 %v239_v16, %v232_v15 }
 0x298   :  { %467 = vtanh.f32 %v241_v17 }
 0x2a5   :  { %v468_v18 = vpop.eup %467 }
 0x2a6   :  { %256 = vperm.xlu0 %445, %v468_v18   ;;  %245 = vperm.xlu1 %444, %v468_v18   ;;  %v404_v21 = vsel %vm403_vm5, %v402_v60, %v468_v18 }
 0x2aa   :  { %446 = vset.pattern.permute.xlu1 %v479_v3  ;;  %448 = vset.pattern.permute.xlu0 %v480_v4 }
 0x2ab   :  { %265 = vperm.xlu1 %446, %v468_v18  }
 0x2af   :  { %447 = vset.pattern.permute.xlu1 %v481_v19 }
 0x2b0   :  { %274 = vperm.xlu1 %447, %v468_v18  }
 0x2b4   :  { %449 = vset.pattern.permute.xlu1 %v482_v20 }
 0x321   :  { %v257_v23 = vpop.permute.xlu0 %256  ;;  %v246_v25 = vpop.permute.xlu1 %245 }
 0x322   :  { %v250_v26 = vmul.f32 %v576_v22, %v246_v25  ;;  %v259_v28 = vmul.f32 %v257_v23, %v564_v61 }
 0x324   :  { %v252_v29 = vrot.slane %v250_v26, 7  ;;  %v261_v33 = vrot.slane %v259_v28, 7 }
 0x326   :  { %v254_v30 = vadd.f32 %v252_v29, %v527_v9  ;;  %v266_v31 = vpop.permute.xlu1 %265 }
 0x327   :  { %v268_v32 = vmul.f32 %v266_v31, %v552_v41 }
 0x328   :  { %v263_v34 = vadd.f32 %v261_v33, %v254_v30 }
 0x329   :  { %v270_v35 = vrot.slane %v268_v32, 7 }
 0x32b   :  { %v275_v36 = vpop.permute.xlu1 %274  ;;  %v272_v38 = vadd.f32 %v270_v35, %v263_v34 }
 0x32c   :  { %v277_v37 = vmul.f32 %v275_v36, %v521_v5 }
 0x32e   :  { %v279_v39 = vrot.slane %v277_v37, 7 }
 0x330   :  { %v281_v40 = vadd.f32 %v279_v39, %v272_v38 }
 0x332   :  { %469 = vtanh.f32 %v281_v40 }
 0x33f   :  { %v470_v42 = vpop.eup %469 }
 0x340   :  { %296 = vperm.xlu1 %449, %v470_v42   ;;  %285 = vperm.xlu0 %448, %v470_v42   ;;  %v405_v43 = vsel %vm30_vm0, %v404_v21, %v470_v42 }
 0x344   :  { %450 = vset.pattern.permute.xlu1 %v479_v3  ;;  %451 = vset.pattern.permute.xlu0 %v481_v19 }
 0x345   :  { %305 = vperm.xlu1 %450, %v470_v42   ;;  %314 = vperm.xlu0 %451, %v470_v42  }
 0x349   :  { %452 = vset.pattern.permute.xlu1 %v480_v4  ;;  %454 = vset.pattern.permute.xlu0 %v479_v3 }
 0x3bb   :  { %v297_v45 = vpop.permute.xlu1 %296  ;;  %v286_v46 = vpop.permute.xlu0 %285 }
 0x3bc   :  { %v299_v47 = vmul.f32 %v297_v45, %v576_v22  ;;  %v290_v48 = vmul.f32 %v589_v44, %v286_v46 }
 0x3be   :  { %v292_v49 = vrot.slane %v290_v48, 7  ;;  %v301_v50 = vrot.slane %v299_v47, 7 }
 0x3c0   :  { %v294_v51 = vadd.f32 %v292_v49, %v527_v9  ;;  %v306_v52 = vpop.permute.xlu1 %305  ;;  %v315_v53 = vpop.permute.xlu0 %314 }
 0x3c1   :  { %v308_v54 = vmul.f32 %v306_v52, %v564_v61  ;;  %v317_v55 = vmul.f32 %v315_v53, %v552_v41 }
 0x3c2   :  { %v303_v56 = vadd.f32 %v301_v50, %v294_v51 }
 0x3c3   :  { %v310_v57 = vrot.slane %v308_v54, 7  ;;  %v319_v58 = vrot.slane %v317_v55, 7 }
 0x3c5   :  { %v312_v5 = vadd.f32 %v310_v57, %v303_v56 }
 0x3c7   :  { %v321_v59 = vadd.f32 %v319_v58, %v312_v5 }
 0x3c9   :  { %471 = vtanh.f32 %v321_v59 }
 0x3d6   :  { %v472_v60 = vpop.eup %471 }
 0x3d7   :  { %343 = vperm.xlu0 %454, %v472_v60   ;;  %325 = vperm.xlu1 %452, %v472_v60   ;;  %v407_v62 = vsel %vm406_vm6, %v405_v43, %v472_v60 }
 0x3db   :  { %453 = vset.pattern.permute.xlu1 %v482_v20  ;;  %457 = vset.pattern.permute.xlu0 %v482_v20 }
 0x3dc   :  { %334 = vperm.xlu1 %453, %v472_v60  }
 0x3e0   :  { %455 = vset.pattern.permute.xlu1 %v481_v19 }
 0x3e1   :  { %352 = vperm.xlu1 %455, %v472_v60  }
 0x3e5   :  { %456 = vset.pattern.permute.xlu1 %v480_v4 }
 0x452   :  { %v326_v41 = vpop.permute.xlu1 %325  ;;  %v344_v0 = vpop.permute.xlu0 %343 }
 0x453   :  { %v328_v63 = vmul.f32 %v326_v41, %v541_v27  ;;  %v346_v6 = vmul.f32 %v344_v0, %v576_v22 }
 0x455   :  { %v330_v1 = vrot.slane %v328_v63, 7  ;;  %v348_v20 = vrot.slane %v346_v6, 7 }
 0x457   :  { %v335_v2 = vpop.permute.xlu1 %334  ;;  %v332_v8 = vadd.f32 %v330_v1, %v527_v9 }
 0x458   :  { %v337_v7 = vmul.f32 %v335_v2, %v589_v44 }
 0x45a   :  { %v339_v10 = vrot.slane %v337_v7, 7 }
 0x45c   :  { %v341_v11 = vadd.f32 %v339_v10, %v332_v8  ;;  %v353_v12 = vpop.permute.xlu1 %352 }
 0x45d   :  { %v355_v13 = vmul.f32 %v353_v12, %v564_v61 }
 0x45e   :  { %v350_v14 = vadd.f32 %v348_v20, %v341_v11 }
 0x45f   :  { %v357_v4 = vrot.slane %v355_v13, 7 }
 0x461   :  { %v359_v15 = vadd.f32 %v357_v4, %v350_v14 }
 0x463   :  { %473 = vtanh.f32 %v359_v15 }
 0x470   :  { %v474_v16 = vpop.eup %473 }
 0x471   :  { %372 = vperm.xlu0 %457, %v474_v16   ;;  %363 = vperm.xlu1 %456, %v474_v16   ;;  %v409_v17 = vsel %vm408_vm7, %v407_v62, %v474_v16 }
 0x475   :  { %458 = vset.pattern.permute.xlu1 %v479_v3  ;;  %460 = vset.pattern.permute.xlu0 %v481_v19 }
 0x476   :  { %381 = vperm.xlu1 %458, %v474_v16  }
 0x47a   :  { %459 = vset.pattern.permute.xlu1 %v481_v19 }
 0x47b   :  { %390 = vperm.xlu1 %459, %v474_v16  }
 0x4ec   :  { %v373_v18 = vpop.permute.xlu0 %372  ;;  %v364_v21 = vpop.permute.xlu1 %363 }
 0x4ed   :  { %v366_v61 = vmul.f32 %v364_v21, %v535_v24  ;;  %v375_v23 = vmul.f32 %v373_v18, %v541_v27 }
 0x4ef   :  { %v368_v25 = vrot.slane %v366_v61, 7  ;;  %v377_v30 = vrot.slane %v375_v23, 7 }
 0x4f1   :  { %v370_v26 = vadd.f32 %v368_v25, %v527_v9  ;;  %v382_v28 = vpop.permute.xlu1 %381 }
 0x4f2   :  { %v384_v29 = vmul.f32 %v382_v28, %v589_v44 }
 0x4f3   :  { %v379_v3 = vadd.f32 %v377_v30, %v370_v26 }
 0x4f4   :  { %v386_v31 = vrot.slane %v384_v29, 7 }
 0x4f6   :  { %v391_v32 = vpop.permute.xlu1 %390  ;;  %v388_v19 = vadd.f32 %v386_v31, %v379_v3 }
 0x4f7   :  { %v393_v33 = vmul.f32 %v391_v32, %v576_v22 }
 0x4f9   :  { %v395_v34 = vrot.slane %v393_v33, 7 }
 0x4fb   :  { %v397_v35 = vadd.f32 %v395_v34, %v388_v19 }
 0x4fd   :  { %475 = vtanh.f32 %v397_v35 }
 0x50a   :  { %v476_v24 = vpop.eup %475 }
 0x50b   :  { %v411_v36 = vsel %vm410_vm8, %v409_v17, %v476_v24 }
 0x50c   :  { %412 = vst.msk [vmem:[%s621_s4] sm:$0xff] %vm26_vm1, %v411_v36 }

</bundles_post_ra>
